<compile_context>
chip_gen: v7x
topology: tpu7x:2x2x1
jax: 0.10.0
libtpu: 0.0.40
codegen_flags: <defaults>
</compile_context>

<pallas_src>
import functools

import jax
import jax.numpy as jnp
from jax.experimental import pallas as pl
from jax.experimental.pallas import tpu as pltpu


# ----------------------------- Pallas kernel ------------------------------- #
def _msa_kernel(f_g, f_l, n_coef, compute_dtype, approx_sigmoid,
                w_ref, b_ref, sign_ref, bpsi_ref,      # SMEM (scalar prefetch)
                gate_ref, skip_ref, out_ref):          # VMEM blocks
    """Blocks: gate (f_g, rows, 128); skip/out (f_l, rows, 128).

    1x1x1 conv (+ folded BN) over tiny channel counts unrolled as VPU
    scalar-broadcast FMAs; the psi projection is a signed accumulation of
    ReLU terms (|wpsi| folded into the weights on the host); the sigmoid
    rides the EUP; gating is an elementwise multiply with full-width stores.
    """
    cdt = compute_dtype

    def cast(x):
        return x if x.dtype == cdt else x.astype(cdt)

    # Original-precision skip channels are kept for the final gating multiply;
    # compute-precision copies feed the projection math.
    skip_orig = [skip_ref[i] for i in range(f_l)]
    gate_c = [cast(gate_ref[i]) for i in range(f_g)]
    skip_c = [cast(s) for s in skip_orig]

    logit = None
    for j in range(n_coef):
        # Fused gate/skip projection: concat([W_g, W_x]) against the
        # concatenated channels.  |wpsi_j| is already folded into column j of
        # w/b (ReLU(c*x) == c*ReLU(x) for c >= 0); only sign(wpsi_j) remains.
        h = gate_c[0] * cast(w_ref[0, j]) + cast(b_ref[j])
        for i in range(1, f_g):
            h = h + gate_c[i] * cast(w_ref[i, j])
        for i in range(f_l):
            h = h + skip_c[i] * cast(w_ref[f_g + i, j])
        h = jnp.maximum(h, 0.0)                        # ReLU (compute dtype)
        term = cast(sign_ref[j]) * h                   # sign(wpsi_j)*ReLU(.)
        logit = term if logit is None else logit + term

    z = logit.astype(jnp.float32) + bpsi_ref[0]
    if approx_sigmoid:
        # exp + approximate reciprocal both ride the EUP slot (cheap on the
        # VALU-bound v7x / v6e).
        psi = pl.reciprocal(1.0 + jnp.exp(-z), approx=True)
    else:
        psi = jax.nn.sigmoid(z)                        # (rows, 128)

    for i in range(f_l):                               # lane-dense full stores
        out_ref[i] = (skip_orig[i] * psi).astype(out_ref.dtype)


# ------------------------------ Block chooser ------------------------------ #
def _choose_rows(n_rows, per_row_bytes, *, align=8, budget_bytes=12 << 20,
                 batch=1):
    """Pick the sublane block size ("rows") for the (C, rows, 128) tiles.

    Goals:
      * second-minor block dim is a multiple of `align` (8 for f32, 16 for
        bf16) or the full extent;
      * the pipelined VMEM footprint (double-buffered I/O + elementwise
        temporaries = `per_row_bytes` per row) never exceeds `budget_bytes`
        -- no unbounded fallback;
      * prefer an even grid (divisor); otherwise use a ragged, Pallas-masked
        final block;
      * leave enough grid steps for pipelining / the two v7x TensorCores
        without fragmenting tiny problems.
    """
    if n_rows <= align:
        return n_rows                                   # full extent (legal)

    cap = max(align,
              min(budget_bytes // per_row_bytes, n_rows) // align * align)
    rows = None
    for d in range(cap, align - 1, -align):             # largest aligned divisor
        if n_rows % d == 0:
            rows = d
            break
    if rows is None:
        rows = cap            # no divisor <= cap: ragged (masked) last block

    def tiles(rr):
        return batch * ((n_rows + rr - 1) // rr)

    while rows > 8 * align and tiles(rows) < 4:          # megacore / pipeline
        rows = max(align, (rows // 2) // align * align)
    while rows > align and tiles(rows) < 2:
        rows = max(align, (rows // 2) // align * align)
    return rows


# ------------------------------ pallas_call wrapper ------------------------ #
def msa_pallas(gate4, skip4, w_cat, b_cat, sign, bpsi, *, rows_per_block,
               compute_dtype, approx_sigmoid, cost_estimate=None):
    """gate4: (B, F_g, R, 128), skip4: (B, F_l, R, 128) -> (B, F_l, R, 128)."""
    b, f_g, r, lanes = gate4.shape
    f_l = skip4.shape[1]
    n_coef = w_cat.shape[1]
    assert lanes == 128

    kernel = functools.partial(_msa_kernel, f_g, f_l, n_coef,
                               compute_dtype, approx_sigmoid)
    grid = (b, (r + rows_per_block - 1) // rows_per_block)  # ragged tail OK

    return pl.pallas_call(
        kernel,
        out_shape=jax.ShapeDtypeStruct(skip4.shape, skip4.dtype),
        grid_spec=pltpu.PrefetchScalarGridSpec(
            num_scalar_prefetch=4,                     # weights live in SMEM
            grid=grid,
            in_specs=[
                pl.BlockSpec((None, f_g, rows_per_block, lanes),
                             lambda bi, ri, *_: (bi, 0, ri, 0)),   # gate block
                pl.BlockSpec((None, f_l, rows_per_block, lanes),
                             lambda bi, ri, *_: (bi, 0, ri, 0)),   # skip block
            ],
            out_specs=pl.BlockSpec((None, f_l, rows_per_block, lanes),
                                   lambda bi, ri, *_: (bi, 0, ri, 0)),
        ),
        compiler_params=pltpu.CompilerParams(
            dimension_semantics=("parallel", "parallel"),
            vmem_limit_bytes=32 * 1024 * 1024),
        cost_estimate=cost_estimate,
    )(w_cat, b_cat, sign, bpsi, gate4, skip4)


# ------------------------------ Param setup -------------------------------- #
def fold_bn(w, b, gamma, beta, mean, var, eps=1e-5):
    """Fold eval-mode BatchNorm into a 1x1x1 conv (w: (Cin, Cout), b: (Cout,))."""
    scale = gamma / jnp.sqrt(var + eps)                # (Cout,)
    w_eff = w * scale[None, :]
    b_eff = (b - mean) * scale + beta
    return w_eff, b_eff


def init_msa_params(key, f_g, f_l, n_coef):
    ks = jax.random.split(key, 14)
    p = {}
    # W_gate: Conv3d(F_g -> n_coef, k=1) + BN(n_coef)
    p["wg"] = jax.random.normal(ks[0], (f_g, n_coef), jnp.float32) * 0.2
    p["bg"] = jax.random.normal(ks[1], (n_coef,), jnp.float32) * 0.1
    p["g_gamma"] = 1.0 + 0.1 * jax.random.normal(ks[2], (n_coef,), jnp.float32)
    p["g_beta"] = 0.1 * jax.random.normal(ks[3], (n_coef,), jnp.float32)
    p["g_mean"] = 0.05 * jax.random.normal(ks[4], (n_coef,), jnp.float32)
    p["g_var"] = 0.5 + jnp.abs(jax.random.normal(ks[5], (n_coef,), jnp.float32))
    # W_x: Conv3d(F_l -> n_coef, k=1) + BN(n_coef)
    p["wx"] = jax.random.normal(ks[6], (f_l, n_coef), jnp.float32) * 0.2
    p["bx"] = jax.random.normal(ks[7], (n_coef,), jnp.float32) * 0.1
    p["x_gamma"] = 1.0 + 0.1 * jax.random.normal(ks[8], (n_coef,), jnp.float32)
    p["x_beta"] = 0.1 * jax.random.normal(ks[9], (n_coef,), jnp.float32)
    p["x_mean"] = 0.05 * jax.random.normal(ks[10], (n_coef,), jnp.float32)
    p["x_var"] = 0.5 + jnp.abs(jax.random.normal(ks[11], (n_coef,), jnp.float32))
    # psi: Conv3d(n_coef -> 1, k=1) + BN(1) + Sigmoid
    p["wpsi"] = jax.random.normal(ks[12], (n_coef, 1), jnp.float32) * 0.2
    p["bpsi"] = jax.random.normal(ks[13], (1,), jnp.float32) * 0.1
    p["p_gamma"] = jnp.ones((1,), jnp.float32)
    p["p_beta"] = jnp.zeros((1,), jnp.float32)
    p["p_mean"] = jnp.zeros((1,), jnp.float32)
    p["p_var"] = jnp.ones((1,), jnp.float32)
    return p


# ------------------------------ Wrapper (NCDHW) ----------------------------- #
def msa_forward(gate, skip, params, *, compute_dtype=jnp.float32,
                approx_sigmoid=None):
    """gate: (B, F_g, D, H, W), skip: (B, F_l, D, H, W) -> (B, F_l, D, H, W).

    compute_dtype: dtype for the projection/ReLU/psi math.  float32 is exact;
      bfloat16 halves the VALU work and is recommended on v6e / v7x (the
      kernel is VALU-slot-bound there).  Keep float32 on v5e (no bf16 VALU;
      HBM-bound anyway).  The final gating multiply always uses the original
      skip precision.
    approx_sigmoid: EUP exp + approximate reciprocal for the sigmoid
      (defaults to True whenever compute_dtype != float32).
    """
    b, f_g, d, h, w = gate.shape
    f_l = skip.shape[1]
    s_len = d * h * w
    cdt = jnp.dtype(compute_dtype)
    if approx_sigmoid is None:
        approx_sigmoid = cdt != jnp.dtype(jnp.float32)

    wg, bg = fold_bn(params["wg"], params["bg"], params["g_gamma"],
                     params["g_beta"], params["g_mean"], params["g_var"])
    wx, bx = fold_bn(params["wx"], params["bx"], params["x_gamma"],
                     params["x_beta"], params["x_mean"], params["x_var"])
    wpsi, bpsi = fold_bn(params["wpsi"], params["bpsi"], params["p_gamma"],
                         params["p_beta"], params["p_mean"], params["p_var"])

    # Fuse the gate/skip projections into one concatenated contraction and
    # fold |wpsi| into it (ReLU(c*x) == c*ReLU(x) for c >= 0), leaving only
    # sign(wpsi) for the in-kernel psi accumulation.
    wpsi = wpsi.reshape(-1)                            # (n_coef,)
    mag = jnp.abs(wpsi)
    sign = jnp.sign(wpsi)
    w_cat = jnp.concatenate([wg, wx], axis=0) * mag[None, :]   # (F_g+F_l, n_coef)
    b_cat = (bg + bx) * mag                            # eval-mode BN biases add
    bpsi = bpsi.reshape(1)                             # (1,)

    # NCDHW -> (B, C, S) -> (B, C, R, 128): pure reshapes, no transposes, and
    # no padding copies when D*H*W is a multiple of 128 (the common case).
    gate3 = gate.reshape(b, f_g, s_len)
    skip3 = skip.reshape(b, f_l, s_len)
    pad = (-s_len) % 128
    if pad:
        # TODO(synk): a masked ragged-tail epilogue would avoid these two
        # full-tensor HBM copies; segmentation volumes are normally /128.
        gate3 = jnp.pad(gate3, ((0, 0), (0, 0), (0, pad)))
        skip3 = jnp.pad(skip3, ((0, 0), (0, 0), (0, pad)))
    sp = s_len + pad
    r = sp // 128
    gate4 = gate3.reshape(b, f_g, r, 128)
    skip4 = skip3.reshape(b, f_l, r, 128)

    itemsize = jnp.dtype(skip.dtype).itemsize
    align = max(8, 32 // itemsize)                     # 8 for f32, 16 for bf16
    # Per block row: double-buffered gate/skip/out DMA buffers + f32-sized
    # elementwise temporaries (h / logit / psi / compute-dtype channel casts).
    per_row = 2 * (f_g + 2 * f_l) * 128 * itemsize + (f_g + f_l + 4) * 128 * 4
    rows = _choose_rows(r, per_row, align=align, batch=b)

    n_coef = w_cat.shape[1]
    cost = pl.CostEstimate(
        flops=2 * b * s_len * (n_coef * (f_g + f_l + 2) + f_l),
        transcendentals=b * s_len,
        bytes_accessed=b * s_len * (f_g + 2 * f_l) * itemsize)

    out4 = msa_pallas(gate4, skip4, w_cat, b_cat, sign, bpsi,
                      rows_per_block=rows, compute_dtype=cdt,
                      approx_sigmoid=approx_sigmoid, cost_estimate=cost)
    out = out4.reshape(b, f_l, sp)
    if pad:
        out = out[:, :, :s_len]
    return out.reshape(b, f_l, d, h, w)


def msa_reference(gate, skip, params):
    """Pure-JAX reference of the same eval-mode semantics."""
    wg, bg = fold_bn(params["wg"], params["bg"], params["g_gamma"],
                     params["g_beta"], params["g_mean"], params["g_var"])
    wx, bx = fold_bn(params["wx"], params["bx"], params["x_gamma"],
                     params["x_beta"], params["x_mean"], params["x_var"])
    wpsi, bpsi = fold_bn(params["wpsi"], params["bpsi"], params["p_gamma"],
                         params["p_beta"], params["p_mean"], params["p_var"])
    g = jnp.transpose(gate, (0, 2, 3, 4, 1))
    s = jnp.transpose(skip, (0, 2, 3, 4, 1))
    g1 = g @ wg + bg
    x1 = s @ wx + bx
    hdd = jnp.maximum(g1 + x1, 0.0)
    psi = jax.nn.sigmoid(hdd @ wpsi + bpsi)
    out = s * psi
    return jnp.transpose(out, (0, 4, 1, 2, 3))


if __name__ == "__main__":
    # Small shapes: batch=2, F_g=F_l=4, n_coefficients=8, spatial 8x8x8.
    B, F_G, F_L, N_COEF = 2, 4, 4, 8
    D = H = W = 8

    key = jax.random.PRNGKey(0)
    k_gate, k_skip, k_params = jax.random.split(key, 3)

    gate = jax.random.normal(k_gate, (B, F_G, D, H, W), jnp.float32)
    skip = jax.random.normal(k_skip, (B, F_L, D, H, W), jnp.float32)
    params = init_msa_params(k_params, F_G, F_L, N_COEF)

    ref = jax.block_until_ready(msa_reference(gate, skip, params))

    # 1) Exact path: f32 projection math + exact sigmoid.
    fwd = jax.jit(functools.partial(msa_forward, compute_dtype=jnp.float32,
                                    approx_sigmoid=False))
    out = jax.block_until_ready(fwd(gate, skip, params))
    assert out.shape == (B, F_L, D, H, W)
    assert jnp.allclose(out, ref, atol=1e-4, rtol=1e-4), "f32 kernel mismatch"

    # 2) Fast path for the VALU-bound v6e / v7x: bf16 projection math + EUP
    #    sigmoid.  Guarded so backends without bf16 VALU support still finish.
    fast_ok = True
    try:
        fwd_fast = jax.jit(functools.partial(
            msa_forward, compute_dtype=jnp.bfloat16, approx_sigmoid=True))
        out_fast = jax.block_until_ready(fwd_fast(gate, skip, params))
    except Exception:
        fast_ok = False
        print("NOTE: bf16 fast path unavailable on this backend; "
              "float32 path validated above.")
    if fast_ok:
        assert jnp.allclose(out_fast, ref, atol=1e-1, rtol=1e-1), \
            "bf16 fast-path mismatch"

        # 3) bf16 activations in HBM (halves HBM traffic; the main lever on
        #    the purely memory-bound v5e, pairs with bf16 compute elsewhere).
        gate_bf = gate.astype(jnp.bfloat16)
        skip_bf = skip.astype(jnp.bfloat16)
        out_bf = jax.block_until_ready(fwd_fast(gate_bf, skip_bf, params))
        assert out_bf.dtype == jnp.bfloat16
        assert jnp.allclose(out_bf.astype(jnp.float32), ref,
                            atol=2e-1, rtol=2e-1), "bf16-activation mismatch"

    print("KERNEL_OK")
</pallas_src>

<mosaic_0001>
module attributes {stable_mosaic.version = 11 : i64} {
  func.func @_msa_kernel(%arg0: i32, %arg1: i32, %arg2: memref<8x8xf32, #tpu.memory_space<smem>>, %arg3: memref<8xf32, #tpu.memory_space<smem>>, %arg4: memref<8xf32, #tpu.memory_space<smem>>, %arg5: memref<1xf32, #tpu.memory_space<smem>>, %arg6: memref<1x4x4x128xf32, #tpu.memory_space<vmem>>, %arg7: memref<1x4x4x128xf32, #tpu.memory_space<vmem>>, %arg8: memref<1x4x4x128xf32, #tpu.memory_space<vmem>>) attributes {dimension_semantics = [#tpu.dimension_semantics<parallel>, #tpu.dimension_semantics<parallel>], iteration_bounds = array<i64: 2, 1>, scalar_prefetch = 4 : i64, scratch_operands = 0 : i64, tpu.core_type = #tpu.core_type<tc>, window_params = [{transform_indices = @transform_0, window_bounds = array<i64: 1, 4, 4, 128>}, {transform_indices = @transform_1, window_bounds = array<i64: 1, 4, 4, 128>}, {transform_indices = @transform_2, window_bounds = array<i64: 1, 4, 4, 128>}]} {
    %c0 = arith.constant 0 : index
    %c0_0 = arith.constant 0 : index
    %c0_1 = arith.constant 0 : index
    %c0_2 = arith.constant 0 : index
    %0 = vector.load %arg7[%c0, %c0_0, %c0_1, %c0_2] : memref<1x4x4x128xf32, #tpu.memory_space<vmem>>, vector<1x1x4x128xf32>
    %1 = vector.shape_cast %0 : vector<1x1x4x128xf32> to vector<4x128xf32>
    %c0_3 = arith.constant 0 : index
    %c1 = arith.constant 1 : index
    %c0_4 = arith.constant 0 : index
    %c0_5 = arith.constant 0 : index
    %2 = vector.load %arg7[%c0_3, %c1, %c0_4, %c0_5] : memref<1x4x4x128xf32, #tpu.memory_space<vmem>>, vector<1x1x4x128xf32>
    %3 = vector.shape_cast %2 : vector<1x1x4x128xf32> to vector<4x128xf32>
    %c0_6 = arith.constant 0 : index
    %c2 = arith.constant 2 : index
    %c0_7 = arith.constant 0 : index
    %c0_8 = arith.constant 0 : index
    %4 = vector.load %arg7[%c0_6, %c2, %c0_7, %c0_8] : memref<1x4x4x128xf32, #tpu.memory_space<vmem>>, vector<1x1x4x128xf32>
    %5 = vector.shape_cast %4 : vector<1x1x4x128xf32> to vector<4x128xf32>
    %c0_9 = arith.constant 0 : index
    %c3 = arith.constant 3 : index
    %c0_10 = arith.constant 0 : index
    %c0_11 = arith.constant 0 : index
    %6 = vector.load %arg7[%c0_9, %c3, %c0_10, %c0_11] : memref<1x4x4x128xf32, #tpu.memory_space<vmem>>, vector<1x1x4x128xf32>
    %7 = vector.shape_cast %6 : vector<1x1x4x128xf32> to vector<4x128xf32>
    %c0_12 = arith.constant 0 : index
    %c0_13 = arith.constant 0 : index
    %c0_14 = arith.constant 0 : index
    %c0_15 = arith.constant 0 : index
    %8 = vector.load %arg6[%c0_12, %c0_13, %c0_14, %c0_15] : memref<1x4x4x128xf32, #tpu.memory_space<vmem>>, vector<1x1x4x128xf32>
    %9 = vector.shape_cast %8 : vector<1x1x4x128xf32> to vector<4x128xf32>
    %c0_16 = arith.constant 0 : index
    %c1_17 = arith.constant 1 : index
    %c0_18 = arith.constant 0 : index
    %c0_19 = arith.constant 0 : index
    %10 = vector.load %arg6[%c0_16, %c1_17, %c0_18, %c0_19] : memref<1x4x4x128xf32, #tpu.memory_space<vmem>>, vector<1x1x4x128xf32>
    %11 = vector.shape_cast %10 : vector<1x1x4x128xf32> to vector<4x128xf32>
    %c0_20 = arith.constant 0 : index
    %c2_21 = arith.constant 2 : index
    %c0_22 = arith.constant 0 : index
    %c0_23 = arith.constant 0 : index
    %12 = vector.load %arg6[%c0_20, %c2_21, %c0_22, %c0_23] : memref<1x4x4x128xf32, #tpu.memory_space<vmem>>, vector<1x1x4x128xf32>
    %13 = vector.shape_cast %12 : vector<1x1x4x128xf32> to vector<4x128xf32>
    %c0_24 = arith.constant 0 : index
    %c3_25 = arith.constant 3 : index
    %c0_26 = arith.constant 0 : index
    %c0_27 = arith.constant 0 : index
    %14 = vector.load %arg6[%c0_24, %c3_25, %c0_26, %c0_27] : memref<1x4x4x128xf32, #tpu.memory_space<vmem>>, vector<1x1x4x128xf32>
    %15 = vector.shape_cast %14 : vector<1x1x4x128xf32> to vector<4x128xf32>
    %c0_28 = arith.constant 0 : index
    %c0_29 = arith.constant 0 : index
    %16 = memref.load %arg2[%c0_28, %c0_29] : memref<8x8xf32, #tpu.memory_space<smem>>
    %17 = vector.broadcast %16 : f32 to vector<4x128xf32>
    %18 = arith.mulf %9, %17 : vector<4x128xf32>
    %c0_30 = arith.constant 0 : index
    %19 = memref.load %arg3[%c0_30] : memref<8xf32, #tpu.memory_space<smem>>
    %20 = vector.broadcast %19 : f32 to vector<4x128xf32>
    %21 = arith.addf %18, %20 : vector<4x128xf32>
    %c1_31 = arith.constant 1 : index
    %c0_32 = arith.constant 0 : index
    %22 = memref.load %arg2[%c1_31, %c0_32] : memref<8x8xf32, #tpu.memory_space<smem>>
    %23 = vector.broadcast %22 : f32 to vector<4x128xf32>
    %24 = arith.mulf %11, %23 : vector<4x128xf32>
    %25 = arith.addf %21, %24 : vector<4x128xf32>
    %c2_33 = arith.constant 2 : index
    %c0_34 = arith.constant 0 : index
    %26 = memref.load %arg2[%c2_33, %c0_34] : memref<8x8xf32, #tpu.memory_space<smem>>
    %27 = vector.broadcast %26 : f32 to vector<4x128xf32>
    %28 = arith.mulf %13, %27 : vector<4x128xf32>
    %29 = arith.addf %25, %28 : vector<4x128xf32>
    %c3_35 = arith.constant 3 : index
    %c0_36 = arith.constant 0 : index
    %30 = memref.load %arg2[%c3_35, %c0_36] : memref<8x8xf32, #tpu.memory_space<smem>>
    %31 = vector.broadcast %30 : f32 to vector<4x128xf32>
    %32 = arith.mulf %15, %31 : vector<4x128xf32>
    %33 = arith.addf %29, %32 : vector<4x128xf32>
    %c4 = arith.constant 4 : index
    %c0_37 = arith.constant 0 : index
    %34 = memref.load %arg2[%c4, %c0_37] : memref<8x8xf32, #tpu.memory_space<smem>>
    %35 = vector.broadcast %34 : f32 to vector<4x128xf32>
    %36 = arith.mulf %1, %35 : vector<4x128xf32>
    %37 = arith.addf %33, %36 : vector<4x128xf32>
    %c5 = arith.constant 5 : index
    %c0_38 = arith.constant 0 : index
    %38 = memref.load %arg2[%c5, %c0_38] : memref<8x8xf32, #tpu.memory_space<smem>>
    %39 = vector.broadcast %38 : f32 to vector<4x128xf32>
    %40 = arith.mulf %3, %39 : vector<4x128xf32>
    %41 = arith.addf %37, %40 : vector<4x128xf32>
    %c6 = arith.constant 6 : index
    %c0_39 = arith.constant 0 : index
    %42 = memref.load %arg2[%c6, %c0_39] : memref<8x8xf32, #tpu.memory_space<smem>>
    %43 = vector.broadcast %42 : f32 to vector<4x128xf32>
    %44 = arith.mulf %5, %43 : vector<4x128xf32>
    %45 = arith.addf %41, %44 : vector<4x128xf32>
    %c7 = arith.constant 7 : index
    %c0_40 = arith.constant 0 : index
    %46 = memref.load %arg2[%c7, %c0_40] : memref<8x8xf32, #tpu.memory_space<smem>>
    %47 = vector.broadcast %46 : f32 to vector<4x128xf32>
    %48 = arith.mulf %7, %47 : vector<4x128xf32>
    %49 = arith.addf %45, %48 : vector<4x128xf32>
    %cst = arith.constant 0.000000e+00 : f32
    %50 = vector.broadcast %cst : f32 to vector<4x128xf32>
    %51 = arith.maximumf %49, %50 : vector<4x128xf32>
    %c0_41 = arith.constant 0 : index
    %52 = memref.load %arg4[%c0_41] : memref<8xf32, #tpu.memory_space<smem>>
    %53 = vector.broadcast %52 : f32 to vector<4x128xf32>
    %54 = arith.mulf %53, %51 : vector<4x128xf32>
    %c0_42 = arith.constant 0 : index
    %c1_43 = arith.constant 1 : index
    %55 = memref.load %arg2[%c0_42, %c1_43] : memref<8x8xf32, #tpu.memory_space<smem>>
    %56 = vector.broadcast %55 : f32 to vector<4x128xf32>
    %57 = arith.mulf %9, %56 : vector<4x128xf32>
    %c1_44 = arith.constant 1 : index
    %58 = memref.load %arg3[%c1_44] : memref<8xf32, #tpu.memory_space<smem>>
    %59 = vector.broadcast %58 : f32 to vector<4x128xf32>
    %60 = arith.addf %57, %59 : vector<4x128xf32>
    %c1_45 = arith.constant 1 : index
    %c1_46 = arith.constant 1 : index
    %61 = memref.load %arg2[%c1_45, %c1_46] : memref<8x8xf32, #tpu.memory_space<smem>>
    %62 = vector.broadcast %61 : f32 to vector<4x128xf32>
    %63 = arith.mulf %11, %62 : vector<4x128xf32>
    %64 = arith.addf %60, %63 : vector<4x128xf32>
    %c2_47 = arith.constant 2 : index
    %c1_48 = arith.constant 1 : index
    %65 = memref.load %arg2[%c2_47, %c1_48] : memref<8x8xf32, #tpu.memory_space<smem>>
    %66 = vector.broadcast %65 : f32 to vector<4x128xf32>
    %67 = arith.mulf %13, %66 : vector<4x128xf32>
    %68 = arith.addf %64, %67 : vector<4x128xf32>
    %c3_49 = arith.constant 3 : index
    %c1_50 = arith.constant 1 : index
    %69 = memref.load %arg2[%c3_49, %c1_50] : memref<8x8xf32, #tpu.memory_space<smem>>
    %70 = vector.broadcast %69 : f32 to vector<4x128xf32>
    %71 = arith.mulf %15, %70 : vector<4x128xf32>
    %72 = arith.addf %68, %71 : vector<4x128xf32>
    %c4_51 = arith.constant 4 : index
    %c1_52 = arith.constant 1 : index
    %73 = memref.load %arg2[%c4_51, %c1_52] : memref<8x8xf32, #tpu.memory_space<smem>>
    %74 = vector.broadcast %73 : f32 to vector<4x128xf32>
    %75 = arith.mulf %1, %74 : vector<4x128xf32>
    %76 = arith.addf %72, %75 : vector<4x128xf32>
    %c5_53 = arith.constant 5 : index
    %c1_54 = arith.constant 1 : index
    %77 = memref.load %arg2[%c5_53, %c1_54] : memref<8x8xf32, #tpu.memory_space<smem>>
    %78 = vector.broadcast %77 : f32 to vector<4x128xf32>
    %79 = arith.mulf %3, %78 : vector<4x128xf32>
    %80 = arith.addf %76, %79 : vector<4x128xf32>
    %c6_55 = arith.constant 6 : index
    %c1_56 = arith.constant 1 : index
    %81 = memref.load %arg2[%c6_55, %c1_56] : memref<8x8xf32, #tpu.memory_space<smem>>
    %82 = vector.broadcast %81 : f32 to vector<4x128xf32>
    %83 = arith.mulf %5, %82 : vector<4x128xf32>
    %84 = arith.addf %80, %83 : vector<4x128xf32>
    %c7_57 = arith.constant 7 : index
    %c1_58 = arith.constant 1 : index
    %85 = memref.load %arg2[%c7_57, %c1_58] : memref<8x8xf32, #tpu.memory_space<smem>>
    %86 = vector.broadcast %85 : f32 to vector<4x128xf32>
    %87 = arith.mulf %7, %86 : vector<4x128xf32>
    %88 = arith.addf %84, %87 : vector<4x128xf32>
    %cst_59 = arith.constant 0.000000e+00 : f32
    %89 = vector.broadcast %cst_59 : f32 to vector<4x128xf32>
    %90 = arith.maximumf %88, %89 : vector<4x128xf32>
    %c1_60 = arith.constant 1 : index
    %91 = memref.load %arg4[%c1_60] : memref<8xf32, #tpu.memory_space<smem>>
    %92 = vector.broadcast %91 : f32 to vector<4x128xf32>
    %93 = arith.mulf %92, %90 : vector<4x128xf32>
    %94 = arith.addf %54, %93 : vector<4x128xf32>
    %c0_61 = arith.constant 0 : index
    %c2_62 = arith.constant 2 : index
    %95 = memref.load %arg2[%c0_61, %c2_62] : memref<8x8xf32, #tpu.memory_space<smem>>
    %96 = vector.broadcast %95 : f32 to vector<4x128xf32>
    %97 = arith.mulf %9, %96 : vector<4x128xf32>
    %c2_63 = arith.constant 2 : index
    %98 = memref.load %arg3[%c2_63] : memref<8xf32, #tpu.memory_space<smem>>
    %99 = vector.broadcast %98 : f32 to vector<4x128xf32>
    %100 = arith.addf %97, %99 : vector<4x128xf32>
    %c1_64 = arith.constant 1 : index
    %c2_65 = arith.constant 2 : index
    %101 = memref.load %arg2[%c1_64, %c2_65] : memref<8x8xf32, #tpu.memory_space<smem>>
    %102 = vector.broadcast %101 : f32 to vector<4x128xf32>
    %103 = arith.mulf %11, %102 : vector<4x128xf32>
    %104 = arith.addf %100, %103 : vector<4x128xf32>
    %c2_66 = arith.constant 2 : index
    %c2_67 = arith.constant 2 : index
    %105 = memref.load %arg2[%c2_66, %c2_67] : memref<8x8xf32, #tpu.memory_space<smem>>
    %106 = vector.broadcast %105 : f32 to vector<4x128xf32>
    %107 = arith.mulf %13, %106 : vector<4x128xf32>
    %108 = arith.addf %104, %107 : vector<4x128xf32>
    %c3_68 = arith.constant 3 : index
    %c2_69 = arith.constant 2 : index
    %109 = memref.load %arg2[%c3_68, %c2_69] : memref<8x8xf32, #tpu.memory_space<smem>>
    %110 = vector.broadcast %109 : f32 to vector<4x128xf32>
    %111 = arith.mulf %15, %110 : vector<4x128xf32>
    %112 = arith.addf %108, %111 : vector<4x128xf32>
    %c4_70 = arith.constant 4 : index
    %c2_71 = arith.constant 2 : index
    %113 = memref.load %arg2[%c4_70, %c2_71] : memref<8x8xf32, #tpu.memory_space<smem>>
    %114 = vector.broadcast %113 : f32 to vector<4x128xf32>
    %115 = arith.mulf %1, %114 : vector<4x128xf32>
    %116 = arith.addf %112, %115 : vector<4x128xf32>
    %c5_72 = arith.constant 5 : index
    %c2_73 = arith.constant 2 : index
    %117 = memref.load %arg2[%c5_72, %c2_73] : memref<8x8xf32, #tpu.memory_space<smem>>
    %118 = vector.broadcast %117 : f32 to vector<4x128xf32>
    %119 = arith.mulf %3, %118 : vector<4x128xf32>
    %120 = arith.addf %116, %119 : vector<4x128xf32>
    %c6_74 = arith.constant 6 : index
    %c2_75 = arith.constant 2 : index
    %121 = memref.load %arg2[%c6_74, %c2_75] : memref<8x8xf32, #tpu.memory_space<smem>>
    %122 = vector.broadcast %121 : f32 to vector<4x128xf32>
    %123 = arith.mulf %5, %122 : vector<4x128xf32>
    %124 = arith.addf %120, %123 : vector<4x128xf32>
    %c7_76 = arith.constant 7 : index
    %c2_77 = arith.constant 2 : index
    %125 = memref.load %arg2[%c7_76, %c2_77] : memref<8x8xf32, #tpu.memory_space<smem>>
    %126 = vector.broadcast %125 : f32 to vector<4x128xf32>
    %127 = arith.mulf %7, %126 : vector<4x128xf32>
    %128 = arith.addf %124, %127 : vector<4x128xf32>
    %cst_78 = arith.constant 0.000000e+00 : f32
    %129 = vector.broadcast %cst_78 : f32 to vector<4x128xf32>
    %130 = arith.maximumf %128, %129 : vector<4x128xf32>
    %c2_79 = arith.constant 2 : index
    %131 = memref.load %arg4[%c2_79] : memref<8xf32, #tpu.memory_space<smem>>
    %132 = vector.broadcast %131 : f32 to vector<4x128xf32>
    %133 = arith.mulf %132, %130 : vector<4x128xf32>
    %134 = arith.addf %94, %133 : vector<4x128xf32>
    %c0_80 = arith.constant 0 : index
    %c3_81 = arith.constant 3 : index
    %135 = memref.load %arg2[%c0_80, %c3_81] : memref<8x8xf32, #tpu.memory_space<smem>>
    %136 = vector.broadcast %135 : f32 to vector<4x128xf32>
    %137 = arith.mulf %9, %136 : vector<4x128xf32>
    %c3_82 = arith.constant 3 : index
    %138 = memref.load %arg3[%c3_82] : memref<8xf32, #tpu.memory_space<smem>>
    %139 = vector.broadcast %138 : f32 to vector<4x128xf32>
    %140 = arith.addf %137, %139 : vector<4x128xf32>
    %c1_83 = arith.constant 1 : index
    %c3_84 = arith.constant 3 : index
    %141 = memref.load %arg2[%c1_83, %c3_84] : memref<8x8xf32, #tpu.memory_space<smem>>
    %142 = vector.broadcast %141 : f32 to vector<4x128xf32>
    %143 = arith.mulf %11, %142 : vector<4x128xf32>
    %144 = arith.addf %140, %143 : vector<4x128xf32>
    %c2_85 = arith.constant 2 : index
    %c3_86 = arith.constant 3 : index
    %145 = memref.load %arg2[%c2_85, %c3_86] : memref<8x8xf32, #tpu.memory_space<smem>>
    %146 = vector.broadcast %145 : f32 to vector<4x128xf32>
    %147 = arith.mulf %13, %146 : vector<4x128xf32>
    %148 = arith.addf %144, %147 : vector<4x128xf32>
    %c3_87 = arith.constant 3 : index
    %c3_88 = arith.constant 3 : index
    %149 = memref.load %arg2[%c3_87, %c3_88] : memref<8x8xf32, #tpu.memory_space<smem>>
    %150 = vector.broadcast %149 : f32 to vector<4x128xf32>
    %151 = arith.mulf %15, %150 : vector<4x128xf32>
    %152 = arith.addf %148, %151 : vector<4x128xf32>
    %c4_89 = arith.constant 4 : index
    %c3_90 = arith.constant 3 : index
    %153 = memref.load %arg2[%c4_89, %c3_90] : memref<8x8xf32, #tpu.memory_space<smem>>
    %154 = vector.broadcast %153 : f32 to vector<4x128xf32>
    %155 = arith.mulf %1, %154 : vector<4x128xf32>
    %156 = arith.addf %152, %155 : vector<4x128xf32>
    %c5_91 = arith.constant 5 : index
    %c3_92 = arith.constant 3 : index
    %157 = memref.load %arg2[%c5_91, %c3_92] : memref<8x8xf32, #tpu.memory_space<smem>>
    %158 = vector.broadcast %157 : f32 to vector<4x128xf32>
    %159 = arith.mulf %3, %158 : vector<4x128xf32>
    %160 = arith.addf %156, %159 : vector<4x128xf32>
    %c6_93 = arith.constant 6 : index
    %c3_94 = arith.constant 3 : index
    %161 = memref.load %arg2[%c6_93, %c3_94] : memref<8x8xf32, #tpu.memory_space<smem>>
    %162 = vector.broadcast %161 : f32 to vector<4x128xf32>
    %163 = arith.mulf %5, %162 : vector<4x128xf32>
    %164 = arith.addf %160, %163 : vector<4x128xf32>
    %c7_95 = arith.constant 7 : index
    %c3_96 = arith.constant 3 : index
    %165 = memref.load %arg2[%c7_95, %c3_96] : memref<8x8xf32, #tpu.memory_space<smem>>
    %166 = vector.broadcast %165 : f32 to vector<4x128xf32>
    %167 = arith.mulf %7, %166 : vector<4x128xf32>
    %168 = arith.addf %164, %167 : vector<4x128xf32>
    %cst_97 = arith.constant 0.000000e+00 : f32
    %169 = vector.broadcast %cst_97 : f32 to vector<4x128xf32>
    %170 = arith.maximumf %168, %169 : vector<4x128xf32>
    %c3_98 = arith.constant 3 : index
    %171 = memref.load %arg4[%c3_98] : memref<8xf32, #tpu.memory_space<smem>>
    %172 = vector.broadcast %171 : f32 to vector<4x128xf32>
    %173 = arith.mulf %172, %170 : vector<4x128xf32>
    %174 = arith.addf %134, %173 : vector<4x128xf32>
    %c0_99 = arith.constant 0 : index
    %c4_100 = arith.constant 4 : index
    %175 = memref.load %arg2[%c0_99, %c4_100] : memref<8x8xf32, #tpu.memory_space<smem>>
    %176 = vector.broadcast %175 : f32 to vector<4x128xf32>
    %177 = arith.mulf %9, %176 : vector<4x128xf32>
    %c4_101 = arith.constant 4 : index
    %178 = memref.load %arg3[%c4_101] : memref<8xf32, #tpu.memory_space<smem>>
    %179 = vector.broadcast %178 : f32 to vector<4x128xf32>
    %180 = arith.addf %177, %179 : vector<4x128xf32>
    %c1_102 = arith.constant 1 : index
    %c4_103 = arith.constant 4 : index
    %181 = memref.load %arg2[%c1_102, %c4_103] : memref<8x8xf32, #tpu.memory_space<smem>>
    %182 = vector.broadcast %181 : f32 to vector<4x128xf32>
    %183 = arith.mulf %11, %182 : vector<4x128xf32>
    %184 = arith.addf %180, %183 : vector<4x128xf32>
    %c2_104 = arith.constant 2 : index
    %c4_105 = arith.constant 4 : index
    %185 = memref.load %arg2[%c2_104, %c4_105] : memref<8x8xf32, #tpu.memory_space<smem>>
    %186 = vector.broadcast %185 : f32 to vector<4x128xf32>
    %187 = arith.mulf %13, %186 : vector<4x128xf32>
    %188 = arith.addf %184, %187 : vector<4x128xf32>
    %c3_106 = arith.constant 3 : index
    %c4_107 = arith.constant 4 : index
    %189 = memref.load %arg2[%c3_106, %c4_107] : memref<8x8xf32, #tpu.memory_space<smem>>
    %190 = vector.broadcast %189 : f32 to vector<4x128xf32>
    %191 = arith.mulf %15, %190 : vector<4x128xf32>
    %192 = arith.addf %188, %191 : vector<4x128xf32>
    %c4_108 = arith.constant 4 : index
    %c4_109 = arith.constant 4 : index
    %193 = memref.load %arg2[%c4_108, %c4_109] : memref<8x8xf32, #tpu.memory_space<smem>>
    %194 = vector.broadcast %193 : f32 to vector<4x128xf32>
    %195 = arith.mulf %1, %194 : vector<4x128xf32>
    %196 = arith.addf %192, %195 : vector<4x128xf32>
    %c5_110 = arith.constant 5 : index
    %c4_111 = arith.constant 4 : index
    %197 = memref.load %arg2[%c5_110, %c4_111] : memref<8x8xf32, #tpu.memory_space<smem>>
    %198 = vector.broadcast %197 : f32 to vector<4x128xf32>
    %199 = arith.mulf %3, %198 : vector<4x128xf32>
    %200 = arith.addf %196, %199 : vector<4x128xf32>
    %c6_112 = arith.constant 6 : index
    %c4_113 = arith.constant 4 : index
    %201 = memref.load %arg2[%c6_112, %c4_113] : memref<8x8xf32, #tpu.memory_space<smem>>
    %202 = vector.broadcast %201 : f32 to vector<4x128xf32>
    %203 = arith.mulf %5, %202 : vector<4x128xf32>
    %204 = arith.addf %200, %203 : vector<4x128xf32>
    %c7_114 = arith.constant 7 : index
    %c4_115 = arith.constant 4 : index
    %205 = memref.load %arg2[%c7_114, %c4_115] : memref<8x8xf32, #tpu.memory_space<smem>>
    %206 = vector.broadcast %205 : f32 to vector<4x128xf32>
    %207 = arith.mulf %7, %206 : vector<4x128xf32>
    %208 = arith.addf %204, %207 : vector<4x128xf32>
    %cst_116 = arith.constant 0.000000e+00 : f32
    %209 = vector.broadcast %cst_116 : f32 to vector<4x128xf32>
    %210 = arith.maximumf %208, %209 : vector<4x128xf32>
    %c4_117 = arith.constant 4 : index
    %211 = memref.load %arg4[%c4_117] : memref<8xf32, #tpu.memory_space<smem>>
    %212 = vector.broadcast %211 : f32 to vector<4x128xf32>
    %213 = arith.mulf %212, %210 : vector<4x128xf32>
    %214 = arith.addf %174, %213 : vector<4x128xf32>
    %c0_118 = arith.constant 0 : index
    %c5_119 = arith.constant 5 : index
    %215 = memref.load %arg2[%c0_118, %c5_119] : memref<8x8xf32, #tpu.memory_space<smem>>
    %216 = vector.broadcast %215 : f32 to vector<4x128xf32>
    %217 = arith.mulf %9, %216 : vector<4x128xf32>
    %c5_120 = arith.constant 5 : index
    %218 = memref.load %arg3[%c5_120] : memref<8xf32, #tpu.memory_space<smem>>
    %219 = vector.broadcast %218 : f32 to vector<4x128xf32>
    %220 = arith.addf %217, %219 : vector<4x128xf32>
    %c1_121 = arith.constant 1 : index
    %c5_122 = arith.constant 5 : index
    %221 = memref.load %arg2[%c1_121, %c5_122] : memref<8x8xf32, #tpu.memory_space<smem>>
    %222 = vector.broadcast %221 : f32 to vector<4x128xf32>
    %223 = arith.mulf %11, %222 : vector<4x128xf32>
    %224 = arith.addf %220, %223 : vector<4x128xf32>
    %c2_123 = arith.constant 2 : index
    %c5_124 = arith.constant 5 : index
    %225 = memref.load %arg2[%c2_123, %c5_124] : memref<8x8xf32, #tpu.memory_space<smem>>
    %226 = vector.broadcast %225 : f32 to vector<4x128xf32>
    %227 = arith.mulf %13, %226 : vector<4x128xf32>
    %228 = arith.addf %224, %227 : vector<4x128xf32>
    %c3_125 = arith.constant 3 : index
    %c5_126 = arith.constant 5 : index
    %229 = memref.load %arg2[%c3_125, %c5_126] : memref<8x8xf32, #tpu.memory_space<smem>>
    %230 = vector.broadcast %229 : f32 to vector<4x128xf32>
    %231 = arith.mulf %15, %230 : vector<4x128xf32>
    %232 = arith.addf %228, %231 : vector<4x128xf32>
    %c4_127 = arith.constant 4 : index
    %c5_128 = arith.constant 5 : index
    %233 = memref.load %arg2[%c4_127, %c5_128] : memref<8x8xf32, #tpu.memory_space<smem>>
    %234 = vector.broadcast %233 : f32 to vector<4x128xf32>
    %235 = arith.mulf %1, %234 : vector<4x128xf32>
    %236 = arith.addf %232, %235 : vector<4x128xf32>
    %c5_129 = arith.constant 5 : index
    %c5_130 = arith.constant 5 : index
    %237 = memref.load %arg2[%c5_129, %c5_130] : memref<8x8xf32, #tpu.memory_space<smem>>
    %238 = vector.broadcast %237 : f32 to vector<4x128xf32>
    %239 = arith.mulf %3, %238 : vector<4x128xf32>
    %240 = arith.addf %236, %239 : vector<4x128xf32>
    %c6_131 = arith.constant 6 : index
    %c5_132 = arith.constant 5 : index
    %241 = memref.load %arg2[%c6_131, %c5_132] : memref<8x8xf32, #tpu.memory_space<smem>>
    %242 = vector.broadcast %241 : f32 to vector<4x128xf32>
    %243 = arith.mulf %5, %242 : vector<4x128xf32>
    %244 = arith.addf %240, %243 : vector<4x128xf32>
    %c7_133 = arith.constant 7 : index
    %c5_134 = arith.constant 5 : index
    %245 = memref.load %arg2[%c7_133, %c5_134] : memref<8x8xf32, #tpu.memory_space<smem>>
    %246 = vector.broadcast %245 : f32 to vector<4x128xf32>
    %247 = arith.mulf %7, %246 : vector<4x128xf32>
    %248 = arith.addf %244, %247 : vector<4x128xf32>
    %cst_135 = arith.constant 0.000000e+00 : f32
    %249 = vector.broadcast %cst_135 : f32 to vector<4x128xf32>
    %250 = arith.maximumf %248, %249 : vector<4x128xf32>
    %c5_136 = arith.constant 5 : index
    %251 = memref.load %arg4[%c5_136] : memref<8xf32, #tpu.memory_space<smem>>
    %252 = vector.broadcast %251 : f32 to vector<4x128xf32>
    %253 = arith.mulf %252, %250 : vector<4x128xf32>
    %254 = arith.addf %214, %253 : vector<4x128xf32>
    %c0_137 = arith.constant 0 : index
    %c6_138 = arith.constant 6 : index
    %255 = memref.load %arg2[%c0_137, %c6_138] : memref<8x8xf32, #tpu.memory_space<smem>>
    %256 = vector.broadcast %255 : f32 to vector<4x128xf32>
    %257 = arith.mulf %9, %256 : vector<4x128xf32>
    %c6_139 = arith.constant 6 : index
    %258 = memref.load %arg3[%c6_139] : memref<8xf32, #tpu.memory_space<smem>>
    %259 = vector.broadcast %258 : f32 to vector<4x128xf32>
    %260 = arith.addf %257, %259 : vector<4x128xf32>
    %c1_140 = arith.constant 1 : index
    %c6_141 = arith.constant 6 : index
    %261 = memref.load %arg2[%c1_140, %c6_141] : memref<8x8xf32, #tpu.memory_space<smem>>
    %262 = vector.broadcast %261 : f32 to vector<4x128xf32>
    %263 = arith.mulf %11, %262 : vector<4x128xf32>
    %264 = arith.addf %260, %263 : vector<4x128xf32>
    %c2_142 = arith.constant 2 : index
    %c6_143 = arith.constant 6 : index
    %265 = memref.load %arg2[%c2_142, %c6_143] : memref<8x8xf32, #tpu.memory_space<smem>>
    %266 = vector.broadcast %265 : f32 to vector<4x128xf32>
    %267 = arith.mulf %13, %266 : vector<4x128xf32>
    %268 = arith.addf %264, %267 : vector<4x128xf32>
    %c3_144 = arith.constant 3 : index
    %c6_145 = arith.constant 6 : index
    %269 = memref.load %arg2[%c3_144, %c6_145] : memref<8x8xf32, #tpu.memory_space<smem>>
    %270 = vector.broadcast %269 : f32 to vector<4x128xf32>
    %271 = arith.mulf %15, %270 : vector<4x128xf32>
    %272 = arith.addf %268, %271 : vector<4x128xf32>
    %c4_146 = arith.constant 4 : index
    %c6_147 = arith.constant 6 : index
    %273 = memref.load %arg2[%c4_146, %c6_147] : memref<8x8xf32, #tpu.memory_space<smem>>
    %274 = vector.broadcast %273 : f32 to vector<4x128xf32>
    %275 = arith.mulf %1, %274 : vector<4x128xf32>
    %276 = arith.addf %272, %275 : vector<4x128xf32>
    %c5_148 = arith.constant 5 : index
    %c6_149 = arith.constant 6 : index
    %277 = memref.load %arg2[%c5_148, %c6_149] : memref<8x8xf32, #tpu.memory_space<smem>>
    %278 = vector.broadcast %277 : f32 to vector<4x128xf32>
    %279 = arith.mulf %3, %278 : vector<4x128xf32>
    %280 = arith.addf %276, %279 : vector<4x128xf32>
    %c6_150 = arith.constant 6 : index
    %c6_151 = arith.constant 6 : index
    %281 = memref.load %arg2[%c6_150, %c6_151] : memref<8x8xf32, #tpu.memory_space<smem>>
    %282 = vector.broadcast %281 : f32 to vector<4x128xf32>
    %283 = arith.mulf %5, %282 : vector<4x128xf32>
    %284 = arith.addf %280, %283 : vector<4x128xf32>
    %c7_152 = arith.constant 7 : index
    %c6_153 = arith.constant 6 : index
    %285 = memref.load %arg2[%c7_152, %c6_153] : memref<8x8xf32, #tpu.memory_space<smem>>
    %286 = vector.broadcast %285 : f32 to vector<4x128xf32>
    %287 = arith.mulf %7, %286 : vector<4x128xf32>
    %288 = arith.addf %284, %287 : vector<4x128xf32>
    %cst_154 = arith.constant 0.000000e+00 : f32
    %289 = vector.broadcast %cst_154 : f32 to vector<4x128xf32>
    %290 = arith.maximumf %288, %289 : vector<4x128xf32>
    %c6_155 = arith.constant 6 : index
    %291 = memref.load %arg4[%c6_155] : memref<8xf32, #tpu.memory_space<smem>>
    %292 = vector.broadcast %291 : f32 to vector<4x128xf32>
    %293 = arith.mulf %292, %290 : vector<4x128xf32>
    %294 = arith.addf %254, %293 : vector<4x128xf32>
    %c0_156 = arith.constant 0 : index
    %c7_157 = arith.constant 7 : index
    %295 = memref.load %arg2[%c0_156, %c7_157] : memref<8x8xf32, #tpu.memory_space<smem>>
    %296 = vector.broadcast %295 : f32 to vector<4x128xf32>
    %297 = arith.mulf %9, %296 : vector<4x128xf32>
    %c7_158 = arith.constant 7 : index
    %298 = memref.load %arg3[%c7_158] : memref<8xf32, #tpu.memory_space<smem>>
    %299 = vector.broadcast %298 : f32 to vector<4x128xf32>
    %300 = arith.addf %297, %299 : vector<4x128xf32>
    %c1_159 = arith.constant 1 : index
    %c7_160 = arith.constant 7 : index
    %301 = memref.load %arg2[%c1_159, %c7_160] : memref<8x8xf32, #tpu.memory_space<smem>>
    %302 = vector.broadcast %301 : f32 to vector<4x128xf32>
    %303 = arith.mulf %11, %302 : vector<4x128xf32>
    %304 = arith.addf %300, %303 : vector<4x128xf32>
    %c2_161 = arith.constant 2 : index
    %c7_162 = arith.constant 7 : index
    %305 = memref.load %arg2[%c2_161, %c7_162] : memref<8x8xf32, #tpu.memory_space<smem>>
    %306 = vector.broadcast %305 : f32 to vector<4x128xf32>
    %307 = arith.mulf %13, %306 : vector<4x128xf32>
    %308 = arith.addf %304, %307 : vector<4x128xf32>
    %c3_163 = arith.constant 3 : index
    %c7_164 = arith.constant 7 : index
    %309 = memref.load %arg2[%c3_163, %c7_164] : memref<8x8xf32, #tpu.memory_space<smem>>
    %310 = vector.broadcast %309 : f32 to vector<4x128xf32>
    %311 = arith.mulf %15, %310 : vector<4x128xf32>
    %312 = arith.addf %308, %311 : vector<4x128xf32>
    %c4_165 = arith.constant 4 : index
    %c7_166 = arith.constant 7 : index
    %313 = memref.load %arg2[%c4_165, %c7_166] : memref<8x8xf32, #tpu.memory_space<smem>>
    %314 = vector.broadcast %313 : f32 to vector<4x128xf32>
    %315 = arith.mulf %1, %314 : vector<4x128xf32>
    %316 = arith.addf %312, %315 : vector<4x128xf32>
    %c5_167 = arith.constant 5 : index
    %c7_168 = arith.constant 7 : index
    %317 = memref.load %arg2[%c5_167, %c7_168] : memref<8x8xf32, #tpu.memory_space<smem>>
    %318 = vector.broadcast %317 : f32 to vector<4x128xf32>
    %319 = arith.mulf %3, %318 : vector<4x128xf32>
    %320 = arith.addf %316, %319 : vector<4x128xf32>
    %c6_169 = arith.constant 6 : index
    %c7_170 = arith.constant 7 : index
    %321 = memref.load %arg2[%c6_169, %c7_170] : memref<8x8xf32, #tpu.memory_space<smem>>
    %322 = vector.broadcast %321 : f32 to vector<4x128xf32>
    %323 = arith.mulf %5, %322 : vector<4x128xf32>
    %324 = arith.addf %320, %323 : vector<4x128xf32>
    %c7_171 = arith.constant 7 : index
    %c7_172 = arith.constant 7 : index
    %325 = memref.load %arg2[%c7_171, %c7_172] : memref<8x8xf32, #tpu.memory_space<smem>>
    %326 = vector.broadcast %325 : f32 to vector<4x128xf32>
    %327 = arith.mulf %7, %326 : vector<4x128xf32>
    %328 = arith.addf %324, %327 : vector<4x128xf32>
    %cst_173 = arith.constant 0.000000e+00 : f32
    %329 = vector.broadcast %cst_173 : f32 to vector<4x128xf32>
    %330 = arith.maximumf %328, %329 : vector<4x128xf32>
    %c7_174 = arith.constant 7 : index
    %331 = memref.load %arg4[%c7_174] : memref<8xf32, #tpu.memory_space<smem>>
    %332 = vector.broadcast %331 : f32 to vector<4x128xf32>
    %333 = arith.mulf %332, %330 : vector<4x128xf32>
    %334 = arith.addf %294, %333 : vector<4x128xf32>
    %c0_175 = arith.constant 0 : index
    %335 = memref.load %arg5[%c0_175] : memref<1xf32, #tpu.memory_space<smem>>
    %336 = vector.broadcast %335 : f32 to vector<4x128xf32>
    %337 = arith.addf %334, %336 : vector<4x128xf32>
    %338 = arith.negf %337 : vector<4x128xf32>
    %339 = math.exp %338 : vector<4x128xf32>
    %cst_176 = arith.constant 1.000000e+00 : f32
    %340 = vector.broadcast %cst_176 : f32 to vector<4x128xf32>
    %341 = arith.addf %340, %339 : vector<4x128xf32>
    %342 = arith.divf %340, %341 : vector<4x128xf32>
    %343 = arith.mulf %1, %342 : vector<4x128xf32>
    %c0_177 = arith.constant 0 : index
    %c0_178 = arith.constant 0 : index
    %c0_179 = arith.constant 0 : index
    %c0_180 = arith.constant 0 : index
    %344 = vector.load %arg8[%c0_177, %c0_178, %c0_179, %c0_180] : memref<1x4x4x128xf32, #tpu.memory_space<vmem>>, vector<1x1x4x128xf32>
    %345 = vector.shape_cast %344 : vector<1x1x4x128xf32> to vector<4x128xf32>
    %346 = vector.shape_cast %343 : vector<4x128xf32> to vector<1x1x4x128xf32>
    tpu.vector_store %arg8[%c0_177, %c0_178, %c0_179, %c0_180], %346 {strides = array<i32>} : memref<1x4x4x128xf32, #tpu.memory_space<vmem>>, vector<1x1x4x128xf32>,
    %347 = arith.mulf %3, %342 : vector<4x128xf32>
    %c0_181 = arith.constant 0 : index
    %c1_182 = arith.constant 1 : index
    %c0_183 = arith.constant 0 : index
    %c0_184 = arith.constant 0 : index
    %348 = vector.load %arg8[%c0_181, %c1_182, %c0_183, %c0_184] : memref<1x4x4x128xf32, #tpu.memory_space<vmem>>, vector<1x1x4x128xf32>
    %349 = vector.shape_cast %348 : vector<1x1x4x128xf32> to vector<4x128xf32>
    %350 = vector.shape_cast %347 : vector<4x128xf32> to vector<1x1x4x128xf32>
    tpu.vector_store %arg8[%c0_181, %c1_182, %c0_183, %c0_184], %350 {strides = array<i32>} : memref<1x4x4x128xf32, #tpu.memory_space<vmem>>, vector<1x1x4x128xf32>,
    %351 = arith.mulf %5, %342 : vector<4x128xf32>
    %c0_185 = arith.constant 0 : index
    %c2_186 = arith.constant 2 : index
    %c0_187 = arith.constant 0 : index
    %c0_188 = arith.constant 0 : index
    %352 = vector.load %arg8[%c0_185, %c2_186, %c0_187, %c0_188] : memref<1x4x4x128xf32, #tpu.memory_space<vmem>>, vector<1x1x4x128xf32>
    %353 = vector.shape_cast %352 : vector<1x1x4x128xf32> to vector<4x128xf32>
    %354 = vector.shape_cast %351 : vector<4x128xf32> to vector<1x1x4x128xf32>
    tpu.vector_store %arg8[%c0_185, %c2_186, %c0_187, %c0_188], %354 {strides = array<i32>} : memref<1x4x4x128xf32, #tpu.memory_space<vmem>>, vector<1x1x4x128xf32>,
    %355 = arith.mulf %7, %342 : vector<4x128xf32>
    %c0_189 = arith.constant 0 : index
    %c3_190 = arith.constant 3 : index
    %c0_191 = arith.constant 0 : index
    %c0_192 = arith.constant 0 : index
    %356 = vector.load %arg8[%c0_189, %c3_190, %c0_191, %c0_192] : memref<1x4x4x128xf32, #tpu.memory_space<vmem>>, vector<1x1x4x128xf32>
    %357 = vector.shape_cast %356 : vector<1x1x4x128xf32> to vector<4x128xf32>
    %358 = vector.shape_cast %355 : vector<4x128xf32> to vector<1x1x4x128xf32>
    tpu.vector_store %arg8[%c0_189, %c3_190, %c0_191, %c0_192], %358 {strides = array<i32>} : memref<1x4x4x128xf32, #tpu.memory_space<vmem>>, vector<1x1x4x128xf32>,
    return
  }
  func.func @transform_0(%arg0: i32, %arg1: i32, %arg2: memref<8x8xf32, #tpu.memory_space<smem>>, %arg3: memref<8xf32, #tpu.memory_space<smem>>, %arg4: memref<8xf32, #tpu.memory_space<smem>>, %arg5: memref<1xf32, #tpu.memory_space<smem>>) -> (i32, i32, i32, i32) {
    %c0_i32 = arith.constant 0 : i32
    %c0_i32_0 = arith.constant 0 : i32
    %c0_i32_1 = arith.constant 0 : i32
    return %arg0, %c0_i32, %arg1, %c0_i32_0 : i32, i32, i32, i32
  }
  func.func @transform_1(%arg0: i32, %arg1: i32, %arg2: memref<8x8xf32, #tpu.memory_space<smem>>, %arg3: memref<8xf32, #tpu.memory_space<smem>>, %arg4: memref<8xf32, #tpu.memory_space<smem>>, %arg5: memref<1xf32, #tpu.memory_space<smem>>) -> (i32, i32, i32, i32) {
    %c0_i32 = arith.constant 0 : i32
    %c0_i32_0 = arith.constant 0 : i32
    %c0_i32_1 = arith.constant 0 : i32
    return %arg0, %c0_i32, %arg1, %c0_i32_0 : i32, i32, i32, i32
  }
  func.func @transform_2(%arg0: i32, %arg1: i32, %arg2: memref<8x8xf32, #tpu.memory_space<smem>>, %arg3: memref<8xf32, #tpu.memory_space<smem>>, %arg4: memref<8xf32, #tpu.memory_space<smem>>, %arg5: memref<1xf32, #tpu.memory_space<smem>>) -> (i32, i32, i32, i32) {
    %c0_i32 = arith.constant 0 : i32
    %c0_i32_0 = arith.constant 0 : i32
    %c0_i32_1 = arith.constant 0 : i32
    return %arg0, %c0_i32, %arg1, %c0_i32_0 : i32, i32, i32, i32
  }
}

</mosaic_0001>

<bundles_post_ra>
// kernel: msa_forward.1
= control target key start
LH: loop header
LB: loop body
LE: loop exit
PB: predicated region body
PF: predicated region fallthrough
CT: control target
= control target key end

     0   :  { %s1270_s0 = inlined_call_operand.vmem [shape: f32[8,8], index: 0, kind: input, shape index: {}]   ;;  %s1271_s4 = inlined_call_operand.vmem [shape: f32[2,4,4,128], index: 4, kind: input, shape index: {}]   ;;  %s1272_s5 = inlined_call_operand.vmem [shape: f32[2,4,4,128], index: 5, kind: input, shape index: {}]   ;;  %s1273_s6 = inlined_call_operand.vmem [shape: f32[2,4,4,128], index: 6, kind: output, shape index: {}]   ;;  %s1274_s1 = inlined_call_operand.vmem [shape: f32[8], index: 1, kind: input, shape index: {}]   ;;  %s1275_s2 = inlined_call_operand.vmem [shape: f32[8], index: 2, kind: input, shape index: {}]   ;;  %s1276_s3 = inlined_call_operand.<no memory space> [shape: f32[1], index: 3, kind: input, shape index: {}]  }
   0x1   :  { %s11_s23 = sshll.u32 %s1270_s0, 4  ;;  %s15_s26 = sshll.u32 %s1274_s1, 4  ;;  %s12_s23 = int_to_ptr.vmem [resolvable:$true] %s11_s23  ;;  %s16_s26 = int_to_ptr.vmem [resolvable:$true] %s15_s26 }
   0x2   :  { %s805_s27 = scalar_lea.vmem %s12_s23, 128  ;;  %p810_p1 = scmp.lt.s32.totalorder %s12_s23, %s12_s23 }
   0x3   :  { %p806_p0 = scmp.ne.s32.totalorder %s12_s23, %s805_s27  ;;  %p811_p2 = scmp.lt.s32.totalorder %s805_s27, %s805_s27 }
   0x5   :  { %p812_p3 = por %p811_p2, %p810_p1 }
   0x7   :  { %p813_p4 = pnand %p812_p3, %p806_p0 }
   0x9   :  { %816 = shalt.err (!%p813_p4)  }
   0xa   :  { %s867_s28 = smov [#allocation3]   ;;  %s817_s29 = scalar_lea.vmem %s16_s26, 16 }
   0xb   :  { %14 = dma.vmem_to_smem %s12_s23, 128, %s867_s28, [#allocation2] }
   0xc   :  { %p818_p5 = scmp.ne.s32.totalorder %s16_s26, %s817_s29  ;;  %p822_p6 = scmp.lt.s32.totalorder %s16_s26, %s16_s26 }
   0xd   :  { %p823_p7 = scmp.lt.s32.totalorder %s817_s29, %s817_s29 }
   0xf   :  { %p824_p8 = por %p823_p7, %p822_p6 }
  0x11   :  { %p825_p9 = pnand %p824_p8, %p818_p5 }
  0x13   :  { %828 = shalt.err (!%p825_p9)  }
  0x14   :  { %s868_s0 = smov [#allocation4]   ;;  %s19_s7 = sshll.u32 %s1275_s2, 4  ;;  %s20_s7 = int_to_ptr.vmem [resolvable:$true] %s19_s7 }
  0x15   :  { %18 = dma.vmem_to_smem %s16_s26, 16, %s868_s0, [#allocation2] }
  0x16   :  { %23 = sst [smem:[#allocation6]] %s1276_s3  ;;  %s829_s10 = scalar_lea.vmem %s20_s7, 16 }
  0x17   :  { %p830_p10 = scmp.ne.s32.totalorder %s20_s7, %s829_s10  ;;  %p834_p11 = scmp.lt.s32.totalorder %s20_s7, %s20_s7 }
  0x18   :  { %p835_p12 = scmp.lt.s32.totalorder %s829_s10, %s829_s10 }
  0x1a   :  { %p836_p13 = por %p835_p12, %p834_p11 }
  0x1c   :  { %p837_p0 = pnand %p836_p13, %p830_p10 }
  0x1e   :  { %840 = shalt.err (!%p837_p0)  }
  0x1f   :  { %s869_s11 = smov [#allocation5]  }
  0x20   :  { %22 = dma.vmem_to_smem %s20_s7, 16, %s869_s11, [#allocation2] }
  0x21   :  { %853 = dma.done.wait [#allocation2], 160 }
  0x22   :  { %854 = vsyncadd [#allocation2], 4294967136 }
  0x23   :  { %25 = sfence }
  0x24   :  { %s917_s12 = smov 0   ;;  %s919_s2 = smov 0  }
  0x25   :  { %s921_s13 = smov 0  }
  0x26 LB: > { %s43_s3 = sadd.s32 1, %s861_s2  ;;  %p675_p1 = scmp.ge.s32.totalorder %s865_s13, 1  ;;  %s865_s13 = sphi %s921_s13, %s31_s13   ;;  %s861_s2 = sphi %s919_s2, %s1278_s2   ;;  %s857_s12 = sphi %s917_s12, %s1277_s12  }
  0x27   : > { %p45_p2 = scmp.ge.s32.totalorder %s43_s3, 2  ;;  %p165_p3 = scmp.lt.s32.totalorder %s865_s13, 3 }
  0x29   : > { %s1280_s3 = smov (%p45_p2, %s43_s3), 0  ;;  %p166_p4 = pnand %p675_p1, %p165_p3 }
  0x2a   : > { %p201_p5 = scmp.lt.s32.totalorder (!%p166_p4), %s857_s12, 1  ;;  %s239_s14 = sld [smem:[#allocation3]] (!%p166_p4) }
  0x2b   : > { %169 = sbr.rel (%p166_p4) target bundleno = 155 (0x9b), region = 28  ;;  %s242_s15 = sld [smem:[#allocation4]] (!%p166_p4) }
  0x2c   : > { %s688_s16 = sld [smem:[#allocation3 + $0x80]] (!%p166_p4)  ;;  %s966_s0 = sld [smem:[#allocation3 + $0x1]] (!%p166_p4) }
  0x2d   : > { %s689_s17 = sld [smem:[#allocation3 + $0x100]] (!%p166_p4)  ;;  %s972_s1 = sld [smem:[#allocation4 + $0x1]] (!%p166_p4) }
  0x2e   : > { %s690_s18 = sld [smem:[#allocation3 + $0x180]] (!%p166_p4)  ;;  %s974_s30 = sld [smem:[#allocation3 + $0x81]] (!%p166_p4) }
  0x2f   : > { %s937_s20 = sld [smem:[#allocation3 + $0x200]] (!%p166_p4)  ;;  %s977_s7 = sld [smem:[#allocation3 + $0x101]] (!%p166_p4) }
  0x30   : > { %v240_v0 = vstv (!%p166_p4), %s239_s14  ;;  %s956_s27 = sld [smem:[#allocation3 + $0x280]] (!%p166_p4)  ;;  %s979_s8 = sld [smem:[#allocation3 + $0x181]] (!%p166_p4) }
  0x31   : > { %v243_v3 = vstv (!%p166_p4), %s242_s15  ;;  %s961_s28 = sld [smem:[#allocation3 + $0x300]] (!%p166_p4)  ;;  %s984_s9 = sld [smem:[#allocation3 + $0x201]] (!%p166_p4) }
  0x32   : > { %s1282_s12 = smov (!%p201_p5, %s857_s12), 1  ;;  %v246_v6 = vstv %s688_s16  ;;  %s963_s29 = sld [smem:[#allocation3 + $0x380]]  ;;  %v278_v28 = vstv %s966_s0 }
  0x33   : > { %s935_s19 = sshll.u32 %s1282_s12, 4  ;;  %v250_v9 = vstv %s689_s17  ;;  %s986_s10 = sld [smem:[#allocation3 + $0x281]]  ;;  %v281_v29 = vstv %s972_s1 }
  0x34   : > { %s208_s23 = scalar_lea.vmem %s1271_s4, %s935_s19  ;;  %s951_s26 = scalar_lea.vmem %s1272_s5, %s935_s19  ;;  %v254_v10 = vstv %s690_s18  ;;  %v284_v30 = vstv %s974_s30 }
  0x35   : > { %v943_v1 = vld [vmem:[%s208_s23] sm:$0xf]  ;;  %v945_v2 = vld [vmem:[%s208_s23 + $0x4] sm:$0xf]  ;;  %v953_v4 = vld [vmem:[%s208_s23 + $0x8] sm:$0xf]  ;;  %v258_v14 = vstv %s937_s20 }
  0x36   : > { %v241_v5 = vmul.f32 %v240_v0, %v943_v1  ;;  %v958_v7 = vld [vmem:[%s208_s23 + $0xc] sm:$0xf]  ;;  %v247_v8 = vmul.f32 %v945_v2, %v246_v6  ;;  %v251_v12 = vmul.f32 %v953_v4, %v250_v9  ;;  %v969_v13 = vld [vmem:[%s951_s26] sm:$0xf]  ;;  %v982_v17 = vld [vmem:[%s951_s26 + $0x4] sm:$0xf]  ;;  %v262_v21 = vstv %s956_s27 }
  0x37   : > { %v255_v16 = vmul.f32 %v958_v7, %v254_v10  ;;  %v989_v18 = vld [vmem:[%s951_s26 + $0x8] sm:$0xf]  ;;  %v259_v20 = vmul.f32 %v258_v14, %v969_v13  ;;  %s993_s11 = sld [smem:[#allocation3 + $0x301]]  ;;  %v266_v22 = vstv %s961_s28  ;;  %s998_s14 = sld [smem:[#allocation5]]  ;;  %v263_v24 = vmul.f32 %v982_v17, %v262_v21  ;;  %v1009_v26 = vld [vmem:[%s951_s26 + $0xc] sm:$0xf] }
  0x38   : > { %v244_v11 = vadd.f32 %v243_v3, %v241_v5  ;;  %s995_s12 = sld [smem:[#allocation3 + $0x381]]  ;;  %s1000_s15 = sld [smem:[#allocation3 + $0x2]]  ;;  %v270_v25 = vstv %s963_s29  ;;  %v267_v27 = vmul.f32 %v989_v18, %v266_v22  ;;  %v279_v32 = vmul.f32 %v278_v28, %v943_v1 }
  0x39   : > { %s1004_s16 = sld [smem:[#allocation4 + $0x2]]  ;;  %v285_v33 = vmul.f32 %v945_v2, %v284_v30  ;;  %v288_v34 = vstv %s977_s7  ;;  %v292_v35 = vstv %s979_s8  ;;  %v296_v36 = vstv %s984_s9  ;;  %s1037_s25 = sld [smem:[#allocation3 + $0x3]] }
  0x3a   : > { %v248_v15 = vadd.f32 %v247_v8, %v244_v11  ;;  %s1006_s17 = sld [smem:[#allocation3 + $0x82]]  ;;  %v271_v38 = vmul.f32 %v1009_v26, %v270_v25  ;;  %v282_v39 = vadd.f32 %v281_v29, %v279_v32  ;;  %v289_v40 = vmul.f32 %v953_v4, %v288_v34  ;;  %s1039_s26 = sld [smem:[#allocation4 + $0x3]] }
  0x3b   : > { %s1015_s18 = sld [smem:[#allocation3 + $0x102]]  ;;  %v293_v41 = vmul.f32 %v958_v7, %v292_v35  ;;  %v297_v42 = vmul.f32 %v296_v36, %v969_v13  ;;  %v300_v43 = vstv %s986_s10  ;;  %s1043_s27 = sld [smem:[#allocation3 + $0x83]] }
  0x3c   : > { %v252_v19 = vadd.f32 %v251_v12, %v248_v15  ;;  %s1017_s20 = sld [smem:[#allocation3 + $0x182]]  ;;  %v286_v45 = vadd.f32 %v285_v33, %v282_v39  ;;  %s1045_s28 = sld [smem:[#allocation3 + $0x103]]  ;;  %v301_v61 = vmul.f32 %v982_v17, %v300_v43 }
  0x3d   : > { %s1022_s21 = sld [smem:[#allocation3 + $0x202]]  ;;  %v304_v46 = vstv %s993_s11  ;;  %s1051_s29 = sld [smem:[#allocation3 + $0x183]]  ;;  %v275_v56 = vstv %s998_s14 }
  0x3e   : > { %v256_v23 = vadd.f32 %v255_v16, %v252_v19  ;;  %s1024_s22 = sld [smem:[#allocation3 + $0x282]]  ;;  %v308_v47 = vstv %s995_s12  ;;  %v317_v48 = vstv %s1000_s15  ;;  %s1053_s0 = sld [smem:[#allocation3 + $0x203]]  ;;  %v290_v53 = vadd.f32 %v289_v40, %v286_v45 }
  0x3f   : > { %s1030_s23 = sld [smem:[#allocation3 + $0x302]]  ;;  %v320_v49 = vstv %s1004_s16  ;;  %v318_v54 = vmul.f32 %v317_v48, %v943_v1  ;;  %s1058_s1 = sld [smem:[#allocation5 + $0x1]]  ;;  %v305_v3 = vmul.f32 %v989_v18, %v304_v46  ;;  %v309_v5 = vmul.f32 %v1009_v26, %v308_v47 }
  0x40   : > { %v260_v31 = vadd.f32 %v259_v20, %v256_v23  ;;  %s1032_s24 = sld [smem:[#allocation3 + $0x382]]  ;;  %v323_v50 = vstv %s1006_s17  ;;  %s1063_s30 = sld [smem:[#allocation3 + $0x283]]  ;;  %v294_v60 = vadd.f32 %v293_v41, %v290_v53  ;;  %v356_v15 = vstv %s1037_s25 }
  0x41   : > { %v327_v51 = vstv %s1015_s18  ;;  %v324_v55 = vmul.f32 %v945_v2, %v323_v50  ;;  %v321_v62 = vadd.f32 %v320_v49, %v318_v54  ;;  %s1070_s7 = sld [smem:[#allocation3 + $0x4]]  ;;  %s1074_s8 = sld [smem:[#allocation3 + $0x303]]  ;;  %v359_v16 = vstv %s1039_s26 }
  0x42   : > { %v264_v37 = vadd.f32 %v263_v24, %v260_v31  ;;  %v331_v57 = vstv %s1017_s20  ;;  %v328_v63 = vmul.f32 %v953_v4, %v327_v51  ;;  %v298_v8 = vadd.f32 %v297_v42, %v294_v60  ;;  %s1076_s9 = sld [smem:[#allocation4 + $0x4]]  ;;  %s1092_s12 = sld [smem:[#allocation3 + $0x383]] }
  0x43   : > { %v335_v58 = vstv %s1022_s21  ;;  %v332_v6 = vmul.f32 %v958_v7, %v331_v57  ;;  %v325_v9 = vadd.f32 %v324_v55, %v321_v62  ;;  %s1082_s10 = sld [smem:[#allocation3 + $0x84]]  ;;  %v357_v21 = vmul.f32 %v356_v15, %v943_v1  ;;  %s1106_s18 = sld [smem:[#allocation5 + $0x2]] }
  0x44   : > { %v268_v44 = vadd.f32 %v267_v27, %v264_v37  ;;  %v339_v59 = vstv %s1024_s22  ;;  %v336_v10 = vmul.f32 %v335_v58, %v969_v13  ;;  %s1084_s11 = sld [smem:[#allocation3 + $0x104]]  ;;  %v302_v19 = vadd.f32 %v301_v61, %v298_v8  ;;  %s1114_s20 = sld [smem:[#allocation3 + $0x5]] }
  0x45   : > { %v340_v11 = vmul.f32 %v982_v17, %v339_v59  ;;  %v343_v12 = vstv %s1030_s23  ;;  %v329_v20 = vadd.f32 %v328_v63, %v325_v9  ;;  %v362_v22 = vstv %s1043_s27  ;;  %s1094_s14 = sld [smem:[#allocation3 + $0x184]]  ;;  %s1118_s21 = sld [smem:[#allocation4 + $0x5]] }
  0x46   : > { %v272_v52 = vadd.f32 %v271_v38, %v268_v44  ;;  %v347_v14 = vstv %s1032_s24  ;;  %v363_v23 = vmul.f32 %v945_v2, %v362_v22  ;;  %v366_v24 = vstv %s1045_s28  ;;  %s1097_s15 = sld [smem:[#allocation3 + $0x204]]  ;;  %s1124_s22 = sld [smem:[#allocation3 + $0x85]] }
  0x47   : > { %v370_v25 = vstv %s1051_s29  ;;  %v374_v27 = vstv %s1053_s0  ;;  %v306_v28 = vadd.f32 %v305_v3, %v302_v19  ;;  %v333_v29 = vadd.f32 %v332_v6, %v329_v20  ;;  %s1102_s16 = sld [smem:[#allocation3 + $0x284]]  ;;  %s1126_s23 = sld [smem:[#allocation3 + $0x105]] }
  0x48   : > { %v273_v0 = vmax.f32 %v272_v52, 0.0  ;;  %v360_v30 = vadd.f32 %v359_v16, %v357_v21  ;;  %v367_v31 = vmul.f32 %v953_v4, %v366_v24  ;;  %v313_v32 = vstv %s1058_s1  ;;  %s1104_s17 = sld [smem:[#allocation3 + $0x304]]  ;;  %s1134_s25 = sld [smem:[#allocation3 + $0x185]] }
  0x49   : > { %v344_v33 = vmul.f32 %v989_v18, %v343_v12  ;;  %v378_v34 = vstv %s1063_s30  ;;  %v310_v35 = vadd.f32 %v309_v5, %v306_v28  ;;  %v337_v36 = vadd.f32 %v336_v10, %v333_v29  ;;  %s1129_s24 = sld [smem:[#allocation3 + $0x384]]  ;;  %s1136_s26 = sld [smem:[#allocation3 + $0x205]] }
  0x4a   : > { %v364_v37 = vadd.f32 %v363_v23, %v360_v30  ;;  %v371_v38 = vmul.f32 %v958_v7, %v370_v25  ;;  %v1109_v39 = vmul.f32 %v275_v56, %v273_v0  ;;  %v348_v40 = vmul.f32 %v1009_v26, %v347_v14  ;;  %s1139_s27 = sld [smem:[#allocation5 + $0x3]]  ;;  %s1145_s28 = sld [smem:[#allocation3 + $0x285]] }
  0x4b   : > { %v375_v41 = vmul.f32 %v374_v27, %v969_v13  ;;  %v395_v42 = vstv %s1070_s7  ;;  %v341_v43 = vadd.f32 %v340_v11, %v337_v36  ;;  %v379_v45 = vmul.f32 %v982_v17, %v378_v34  ;;  %s1149_s29 = sld [smem:[#allocation3 + $0x305]]  ;;  %s1155_s1 = sld [smem:[#allocation3 + $0x6]] }
  0x4c   : > { %v368_v44 = vadd.f32 %v367_v31, %v364_v37  ;;  %v382_v46 = vstv %s1074_s8  ;;  %v396_v47 = vmul.f32 %v395_v42, %v943_v1  ;;  %v398_v48 = vstv %s1076_s9  ;;  %s1153_s0 = sld [smem:[#allocation3 + $0x385]]  ;;  %s1160_s30 = sld [smem:[#allocation4 + $0x6]] }
  0x4d   : > { %v401_v49 = vstv %s1082_s10  ;;  %v405_v50 = vstv %s1084_s11  ;;  %v311_v51 = vmax.f32 %v310_v35, 0.0  ;;  %v345_v52 = vadd.f32 %v344_v33, %v341_v43  ;;  %s1162_s7 = sld [smem:[#allocation3 + $0x86]]  ;;  %s1179_s11 = sld [smem:[#allocation5 + $0x4]] }
  0x4e   : > { %v372_v53 = vadd.f32 %v371_v38, %v368_v44  ;;  %v402_v54 = vmul.f32 %v945_v2, %v401_v49  ;;  %v386_v55 = vstv %s1092_s12  ;;  %v399_v56 = vadd.f32 %v398_v48, %v396_v47  ;;  %s1167_s8 = sld [smem:[#allocation3 + $0x106]] }
  0x4f   : > { %v406_v57 = vmul.f32 %v953_v4, %v405_v50  ;;  %v409_v58 = vstv %s1094_s14  ;;  %v349_v59 = vadd.f32 %v348_v40, %v345_v52  ;;  %v383_v61 = vmul.f32 %v989_v18, %v382_v46  ;;  %s1169_s9 = sld [smem:[#allocation3 + $0x186]] }
  0x50   : > { %v376_v60 = vadd.f32 %v375_v41, %v372_v53  ;;  %v413_v62 = vstv %s1097_s15  ;;  %v403_v63 = vadd.f32 %v402_v54, %v399_v56  ;;  %v410_v0 = vmul.f32 %v958_v7, %v409_v58  ;;  %s1176_s10 = sld [smem:[#allocation3 + $0x206]]  ;;  %s1191_s15 = sld [smem:[#allocation3 + $0x7]] }
  0x51   : > { %v417_v3 = vstv %s1102_s16  ;;  %v421_v5 = vstv %s1104_s17  ;;  %v314_v6 = vmul.f32 %v313_v32, %v311_v51  ;;  %v352_v8 = vstv %s1106_s18  ;;  %s1184_s12 = sld [smem:[#allocation3 + $0x286]]  ;;  %s1195_s16 = sld [smem:[#allocation4 + $0x7]] }
  0x52   : > { %v380_v9 = vadd.f32 %v379_v45, %v376_v60  ;;  %v387_v10 = vmul.f32 %v1009_v26, %v386_v55  ;;  %v350_v11 = vmax.f32 %v349_v59, 0.0  ;;  %v407_v12 = vadd.f32 %v406_v57, %v403_v63  ;;  %s1189_s14 = sld [smem:[#allocation3 + $0x306]]  ;;  %s1197_s17 = sld [smem:[#allocation3 + $0x87]] }
  0x53   : > { %v414_v14 = vmul.f32 %v413_v62, %v969_v13  ;;  %v434_v15 = vstv %s1114_s20  ;;  %v418_v19 = vmul.f32 %v982_v17, %v417_v3  ;;  %v422_v20 = vmul.f32 %v989_v18, %v421_v5  ;;  %s1202_s18 = sld [smem:[#allocation3 + $0x386]]  ;;  %s1208_s20 = sld [smem:[#allocation3 + $0x107]] }
  0x54   : > { %v384_v16 = vadd.f32 %v383_v61, %v380_v9  ;;  %v435_v21 = vmul.f32 %v434_v15, %v943_v1  ;;  %v411_v22 = vadd.f32 %v410_v0, %v407_v12  ;;  %v437_v23 = vstv %s1118_s21  ;;  %s1210_s21 = sld [smem:[#allocation3 + $0x187]] }
  0x55   : > { %v440_v24 = vstv %s1124_s22  ;;  %v444_v25 = vstv %s1126_s23  ;;  %v425_v28 = vstv %s1129_s24  ;;  %v448_v33 = vstv %s1134_s25  ;;  %s1215_s22 = sld [smem:[#allocation3 + $0x207]]  ;;  %s1225_s24 = sld [smem:[#allocation5 + $0x5]] }
  0x56   : > { %v388_v27 = vadd.f32 %v387_v10, %v384_v16  ;;  %v438_v29 = vadd.f32 %v437_v23, %v435_v21  ;;  %v441_v30 = vmul.f32 %v945_v2, %v440_v24  ;;  %v415_v31 = vadd.f32 %v414_v14, %v411_v22  ;;  %s1221_s23 = sld [smem:[#allocation3 + $0x287]] }
  0x57   : > { %v445_v32 = vmul.f32 %v953_v4, %v444_v25  ;;  %v452_v34 = vstv %s1136_s26  ;;  %v391_v35 = vstv %s1139_s27  ;;  %v449_v37 = vmul.f32 %v958_v7, %v448_v33  ;;  %s1230_s25 = sld [smem:[#allocation3 + $0x307]]  ;;  %s754_s27 = sld [smem:[#allocation5 + $0x6]] }
  0x58   : > { %v442_v36 = vadd.f32 %v441_v30, %v438_v29  ;;  %v315_v38 = vadd.f32 %v314_v6, %v1109_v39  ;;  %v353_v40 = vmul.f32 %v352_v8, %v350_v11  ;;  %v419_v41 = vadd.f32 %v418_v19, %v415_v31  ;;  %s1239_s26 = sld [smem:[#allocation3 + $0x387]] }
  0x59   : > { %v456_v42 = vstv %s1145_s28  ;;  %v426_v43 = vmul.f32 %v1009_v26, %v425_v28  ;;  %v453_v45 = vmul.f32 %v452_v34, %v969_v13  ;;  %v460_v46 = vstv %s1149_s29  ;;  %s764_s28 = sld [smem:[#allocation5 + $0x7]]  ;;  %s550_s29 = sld [smem:[#allocation6]] }
  0x5a   : > { %v446_v44 = vadd.f32 %v445_v32, %v442_v36  ;;  %v389_v39 = vmax.f32 %v388_v27, 0.0  ;;  %v423_v47 = vadd.f32 %v422_v20, %v419_v41  ;;  %v464_v48 = vstv %s1153_s0 }
  0x5b   : > { %v473_v49 = vstv %s1155_s1  ;;  %v457_v51 = vmul.f32 %v982_v17, %v456_v42  ;;  %v476_v53 = vstv %s1160_s30  ;;  %v461_v54 = vmul.f32 %v989_v18, %v460_v46  ;;  %s224_s30 = scalar_lea.vmem %s1273_s6, %s935_s19 }
  0x5c   : > { %v450_v50 = vadd.f32 %v449_v37, %v446_v44  ;;  %v474_v52 = vmul.f32 %v473_v49, %v943_v1  ;;  %v479_v55 = vstv %s1162_s7  ;;  %v483_v56 = vstv %s1167_s8 }
  0x5d   : > { %v487_v57 = vstv %s1169_s9  ;;  %v480_v60 = vmul.f32 %v945_v2, %v479_v55  ;;  %v484_v61 = vmul.f32 %v953_v4, %v483_v56  ;;  %v427_v62 = vadd.f32 %v426_v43, %v423_v47 }
  0x5e   : > { %v454_v58 = vadd.f32 %v453_v45, %v450_v50  ;;  %v477_v59 = vadd.f32 %v476_v53, %v474_v52  ;;  %v491_v63 = vstv %s1176_s10  ;;  %v430_v0 = vstv %s1179_s11 }
  0x5f   : > { %v488_v6 = vmul.f32 %v958_v7, %v487_v57  ;;  %v354_v8 = vadd.f32 %v353_v40, %v315_v38  ;;  %v392_v9 = vmul.f32 %v391_v35, %v389_v39  ;;  %v465_v10 = vmul.f32 %v1009_v26, %v464_v48 }
  0x60   : > { %v458_v3 = vadd.f32 %v457_v51, %v454_v58  ;;  %v481_v5 = vadd.f32 %v480_v60, %v477_v59  ;;  %v495_v11 = vstv %s1184_s12  ;;  %v492_v15 = vmul.f32 %v491_v63, %v969_v13 }
  0x61   : > { %v499_v16 = vstv %s1189_s14  ;;  %v428_v19 = vmax.f32 %v427_v62, 0.0  ;;  %v512_v20 = vstv %s1191_s15  ;;  %v515_v21 = vstv %s1195_s16 }
  0x62   : > { %v462_v12 = vadd.f32 %v461_v54, %v458_v3  ;;  %v485_v14 = vadd.f32 %v484_v61, %v481_v5  ;;  %v518_v22 = vstv %s1197_s17  ;;  %v496_v24 = vmul.f32 %v982_v17, %v495_v11 }
  0x63   : > { %v513_v25 = vmul.f32 %v512_v20, %v943_v1  ;;  %v519_v27 = vmul.f32 %v945_v2, %v518_v22  ;;  %v500_v28 = vmul.f32 %v989_v18, %v499_v16  ;;  %v503_v29 = vstv %s1202_s18 }
  0x64   : > { %v489_v23 = vadd.f32 %v488_v6, %v485_v14  ;;  %v522_v30 = vstv %s1208_s20  ;;  %v526_v31 = vstv %s1210_s21  ;;  %v466_v32 = vadd.f32 %v465_v10, %v462_v12 }
  0x65   : > { %v516_v34 = vadd.f32 %v515_v21, %v513_v25  ;;  %v523_v35 = vmul.f32 %v953_v4, %v522_v30  ;;  %v530_v36 = vstv %s1215_s22  ;;  %v504_v2 = vmul.f32 %v1009_v26, %v503_v29 }
  0x66   : > { %v493_v33 = vadd.f32 %v492_v15, %v489_v23  ;;  %v527_v38 = vmul.f32 %v958_v7, %v526_v31  ;;  %v393_v40 = vadd.f32 %v392_v9, %v354_v8  ;;  %v431_v41 = vmul.f32 %v430_v0, %v428_v19 }
  0x67   : > { %v520_v37 = vadd.f32 %v519_v27, %v516_v34  ;;  %v534_v42 = vstv %s1221_s23  ;;  %v467_v43 = vmax.f32 %v466_v32, 0.0  ;;  %v531_v46 = vmul.f32 %v530_v36, %v969_v13 }
  0x68   : > { %v497_v1 = vadd.f32 %v496_v24, %v493_v33  ;;  %v469_v39 = vstv %s1225_s24  ;;  %v538_v47 = vstv %s1230_s25  ;;  %v535_v49 = vmul.f32 %v982_v17, %v534_v42 }
  0x69   : > { %v524_v45 = vadd.f32 %v523_v35, %v520_v37  ;;  %v432_v50 = vadd.f32 %v431_v41, %v393_v40  ;;  %v542_v51 = vstv %s1239_s26  ;;  %v470_v52 = vmul.f32 %v469_v39, %v467_v43 }
  0x6a   : > { %v501_v44 = vadd.f32 %v500_v28, %v497_v1  ;;  %v539_v54 = vmul.f32 %v989_v18, %v538_v47  ;;  %v508_v55 = vstv %s754_s27  ;;  %v543_v57 = vmul.f32 %v1009_v26, %v542_v51 }
  0x6b   : > { %v528_v48 = vadd.f32 %v527_v38, %v524_v45  ;;  %v471_v58 = vadd.f32 %v470_v52, %v432_v50  ;;  %v547_v62 = vstv %s764_s28  ;;  %v551_v5 = vstv %s550_s29 }
  0x6c   : > { %v505_v4 = vadd.f32 %v504_v2, %v501_v44 }
  0x6d   : > { %v532_v7 = vadd.f32 %v531_v46, %v528_v48 }
  0x6e   : > { %v506_v53 = vmax.f32 %v505_v4, 0.0 }
  0x6f   : > { %v536_v56 = vadd.f32 %v535_v49, %v532_v7 }
  0x70   : > { %v509_v59 = vmul.f32 %v508_v55, %v506_v53 }
  0x71   : > { %v540_v60 = vadd.f32 %v539_v54, %v536_v56 }
  0x72   : > { %v510_v63 = vadd.f32 %v509_v59, %v471_v58 }
  0x73   : > { %v544_v61 = vadd.f32 %v543_v57, %v540_v60 }
  0x75   : > { %v545_v0 = vmax.f32 %v544_v61, 0.0 }
  0x77   : > { %v548_v3 = vmul.f32 %v547_v62, %v545_v0 }
  0x79   : > { %v549_v6 = vadd.f32 %v548_v3, %v510_v63 }
  0x7b   : > { %v552_v8 = vadd.f32 %v551_v5, %v549_v6 }
  0x7d   : > { %v765_v9 = vmul.f32 -1.442695, %v552_v8 }
  0x7f   : > { %801 = vpow2.f32 %v765_v9 }
  0x89   : > { %v802_v10 = vpop.eup %801 }
  0x8a   : > { %v556_v11 = vadd.f32 1.0, %v802_v10 }
  0x8c   : > { %803 = vrcp.f32 %v556_v11 }
  0x96   : > { %v804_v12 = vpop.eup %803 }
  0x97   : > { %v559_v14 = vmul.f32 %v804_v12, %v969_v13  ;;  %v561_v15 = vmul.f32 %v804_v12, %v982_v17  ;;  %v564_v16 = vmul.f32 %v804_v12, %v989_v18  ;;  %v567_v19 = vmul.f32 %v804_v12, %v1009_v26 }
  0x99   : > { %560 = vst [vmem:[%s224_s30] sm:$0xf] %v559_v14  ;;  %766 = vst [vmem:[%s224_s30 + $0x4] sm:$0xf] %v561_v15 }
  0x9a   : > { %767 = vst [vmem:[%s224_s30 + $0x8] sm:$0xf] %v564_v16  ;;  %768 = vst [vmem:[%s224_s30 + $0xc] sm:$0xf] %v567_v19 }
  0x9b PF: > { %s31_s13 = sadd.s32 1, %s865_s13   ;;  %s1277_s12 = smov %s861_s2 }
  0x9c   : > { %p28_p6 = scmp.ge.s32.totalorder %s31_s13, 4   ;;  %s1278_s2 = smov %s1280_s3 }
  0x9e   :  { %30 = sbr.rel (!%p28_p6) target bundleno = 38 (0x26), region = 70 }

</bundles_post_ra>
